<compile_context>
chip_gen: v5e
topology: v5e:2x2
jax: 0.10.0
libtpu: 0.0.40
codegen_flags: <defaults>
</compile_context>

<pallas_src>
import numpy as np

import jax
import jax.numpy as jnp
from jax.experimental import pallas as pl
from jax.experimental.pallas import tpu as pltpu


def focus_conv_kernel(x_ref, w_ref, b_ref, o_ref):
    # x_ref: [1, K, TP]   bf16  space-to-depth pixels (channels x spatial tile)
    # w_ref: [C2, K]      bf16  1x1 conv weight with BN scale folded in
    # b_ref: [C2, 1]      f32   folded BN shift
    # o_ref: [1, C2, TP]  out_dtype (bf16 by default)
    x = x_ref[0]                                                    # [K, TP]
    w = w_ref[...]                                                  # [C2, K]
    y = jnp.dot(w, x, preferred_element_type=jnp.float32)          # MXU, f32 acc
    y = y + b_ref[...]                                              # BN shift (f32)
    o_ref[0] = (y * jax.nn.sigmoid(y)).astype(o_ref.dtype)          # SiLU (exp -> EUP)


def _pick_spatial_tile(P, max_tp=12288):
    """Return (TP, P_pad).

    TP is either == P (full-extent block, always legal) or a multiple of 128
    (lane-dense stores). P_pad is the smallest multiple of TP >= P; if
    P_pad > P the caller pads the input and slices the output back."""
    if P <= max_tp:
        return P, P
    # Prefer the largest multiple of 512 <= max_tp that divides P, then 128.
    for quantum in (512, 128):
        tp = (max_tp // quantum) * quantum
        while tp >= quantum:
            if P % tp == 0:
                return tp, P
            tp -= quantum
    # No suitable divisor: pad P up to a multiple of a 512-aligned tile.
    tp = max(512, (max_tp // 512) * 512)
    p_pad = -(-P // tp) * tp
    return tp, p_pad


def focus_forward(x, conv_w, bn_gamma, bn_beta, bn_mean, bn_var, eps=1e-5,
                  compute_dtype=jnp.bfloat16, out_dtype=jnp.bfloat16,
                  max_tile_p=12288):
    """x: [N, C1, H, W] (NCHW). conv_w: [C2, 4*C1] (1x1 kernel squeezed,
    input-channel order = torch.cat((::2,::2),(1::2,::2),(::2,1::2),(1::2,1::2))).
    Returns [N, C2, H//2, W//2] (NCHW), matching PyTorch Focus (BatchNorm in
    eval/inference semantics)."""
    N, C1, H, W = x.shape
    C2 = conv_w.shape[0]
    assert H % 2 == 0 and W % 2 == 0
    H2, W2 = H // 2, W // 2
    K = 4 * C1
    P = H2 * W2

    # --- space-to-depth: single reshape -> transpose -> reshape --------------
    # New channel index: k_new = c*4 + hoff*2 + woff  (instead of torch.cat's
    # k_old = (2*woff + hoff)*C1 + c).  The weight columns are permuted to match.
    xr = x.reshape(N, C1, H2, 2, W2, 2)                              # (N,C1,H2,ho,W2,wo)
    xc = (jnp.transpose(xr, (0, 1, 3, 5, 2, 4))                      # (N,C1,ho,wo,H2,W2)
          .reshape(N, K, P)
          .astype(compute_dtype))                                    # [N, K, P]

    # --- fold BN into weight/bias host-side, permute columns to new K order ---
    scale = (bn_gamma.astype(jnp.float32)
             / jnp.sqrt(bn_var.astype(jnp.float32) + eps))            # [C2]
    w_folded = (conv_w.reshape(C2, K).astype(jnp.float32)
                * scale[:, None])                                      # [C2, K] torch order
    perm = np.array([(2 * woff + hoff) * C1 + c
                     for c in range(C1) for hoff in range(2) for woff in range(2)],
                    dtype=np.int32)                                    # k_new -> k_old
    w_folded = w_folded[:, perm].astype(compute_dtype)                 # [C2, K] new order
    bias = (bn_beta.astype(jnp.float32)
            - bn_mean.astype(jnp.float32) * scale).reshape(C2, 1)      # [C2, 1] f32

    # --- tiling ---------------------------------------------------------------
    # v7x megacore: keep >= ~8 total grid steps so both TensorCores get work,
    # but never shrink tiles below 2048 lanes (per-step overhead stays tiny).
    min_steps_along_p = max(1, -(-8 // N))
    if P >= 2048 * min_steps_along_p:
        cap = max(2048, (P // min_steps_along_p) // 128 * 128)
        max_tile_p = min(max_tile_p, cap)

    TP, P_pad = _pick_spatial_tile(P, max_tile_p)
    if P_pad != P:
        xc = jnp.pad(xc, ((0, 0), (0, 0), (0, P_pad - P)))
    grid = (N, P_pad // TP)

    out_itemsize = jnp.dtype(out_dtype).itemsize
    cost = pl.CostEstimate(
        flops=int(2 * N * C2 * K * P_pad),
        transcendentals=int(N * C2 * P_pad),
        bytes_accessed=int(N * K * P_pad * 2 + C2 * K * 2 + C2 * 4
                           + N * C2 * P_pad * out_itemsize),
    )

    out = pl.pallas_call(
        focus_conv_kernel,
        out_shape=jax.ShapeDtypeStruct((N, C2, P_pad), out_dtype),
        grid=grid,
        in_specs=[
            pl.BlockSpec((1, K, TP), lambda n, j: (n, 0, j)),
            pl.BlockSpec((C2, K), lambda n, j: (0, 0)),
            pl.BlockSpec((C2, 1), lambda n, j: (0, 0)),
        ],
        out_specs=pl.BlockSpec((1, C2, TP), lambda n, j: (n, 0, j)),
        compiler_params=pltpu.CompilerParams(
            dimension_semantics=("parallel", "parallel"),
            vmem_limit_bytes=32 * 1024 * 1024,
        ),
        cost_estimate=cost,
    )(xc, w_folded, bias)

    if P_pad != P:
        out = out[:, :, :P]
    # [N, C2, P] is already NCHW up to a free reshape.
    return out.reshape(N, C2, H2, W2)


def focus_reference(x, conv_w, bn_gamma, bn_beta, bn_mean, bn_var, eps=1e-5,
                    compute_dtype=jnp.bfloat16):
    """Pure-JAX reference (f32 result) with the same bf16 input/weight rounding
    as the kernel; torch.cat channel order."""
    p0 = x[:, :, ::2, ::2]
    p1 = x[:, :, 1::2, ::2]
    p2 = x[:, :, ::2, 1::2]
    p3 = x[:, :, 1::2, 1::2]
    xc = jnp.concatenate([p0, p1, p2, p3], axis=1)                    # [N, 4C1, H2, W2]
    scale = bn_gamma / jnp.sqrt(bn_var + eps)
    w_folded = (conv_w * scale[:, None]).astype(compute_dtype).astype(jnp.float32)
    bias = bn_beta - bn_mean * scale
    xc32 = xc.astype(compute_dtype).astype(jnp.float32)
    y = jnp.einsum('ck,nkhw->nchw', w_folded, xc32)
    y = y + bias[None, :, None, None]
    return y * jax.nn.sigmoid(y)


if __name__ == "__main__":
    # small shapes consistent with Focus(c1=4, c2=8)
    N, C1, H, W = 2, 4, 16, 16
    C2 = 8

    key = jax.random.PRNGKey(0)
    kx, kw, kg, kb, km, kv = jax.random.split(key, 6)

    x = jax.random.normal(kx, (N, C1, H, W), dtype=jnp.float32)
    conv_w = jax.random.normal(kw, (C2, 4 * C1), dtype=jnp.float32) * 0.1
    bn_gamma = 1.0 + 0.1 * jax.random.normal(kg, (C2,), dtype=jnp.float32)
    bn_beta = 0.1 * jax.random.normal(kb, (C2,), dtype=jnp.float32)
    bn_mean = 0.1 * jax.random.normal(km, (C2,), dtype=jnp.float32)
    bn_var = jnp.abs(1.0 + 0.1 * jax.random.normal(kv, (C2,), dtype=jnp.float32))

    out = jax.jit(focus_forward)(x, conv_w, bn_gamma, bn_beta, bn_mean, bn_var)
    out = jax.block_until_ready(out)

    ref = focus_reference(x, conv_w, bn_gamma, bn_beta, bn_mean, bn_var)
    assert out.shape == (N, C2, H // 2, W // 2), out.shape
    assert out.dtype == jnp.bfloat16, out.dtype
    err = float(jnp.max(jnp.abs(out.astype(jnp.float32) - ref)))
    assert err < 3e-2, err   # bf16 output rounding dominates the tolerance

    print("KERNEL_OK")
</pallas_src>

<mosaic_0001>
module attributes {stable_mosaic.version = 11 : i64} {
  func.func @focus_conv_kernel(%arg0: i32, %arg1: i32, %arg2: memref<1x16x64xbf16, #tpu.memory_space<vmem>>, %arg3: memref<8x16xbf16, #tpu.memory_space<vmem>>, %arg4: memref<8x1xf32, #tpu.memory_space<vmem>>, %arg5: memref<1x8x64xbf16, #tpu.memory_space<vmem>>) attributes {dimension_semantics = [#tpu.dimension_semantics<parallel>, #tpu.dimension_semantics<parallel>], iteration_bounds = array<i64: 2, 1>, scalar_prefetch = 0 : i64, scratch_operands = 0 : i64, tpu.core_type = #tpu.core_type<tc>, window_params = [{transform_indices = @transform_0, window_bounds = array<i64: 1, 16, 64>}, {pipeline_mode = #tpu.pipeline_mode<synchronous>, transform_indices = @transform_1, window_bounds = array<i64: 8, 16>}, {pipeline_mode = #tpu.pipeline_mode<synchronous>, transform_indices = @transform_2, window_bounds = array<i64: 8, 1>}, {transform_indices = @transform_3, window_bounds = array<i64: 1, 8, 64>}]} {
    %c0 = arith.constant 0 : index
    %c0_0 = arith.constant 0 : index
    %c0_1 = arith.constant 0 : index
    %0 = vector.load %arg2[%c0, %c0_0, %c0_1] : memref<1x16x64xbf16, #tpu.memory_space<vmem>>, vector<1x16x64xbf16>
    %1 = vector.shape_cast %0 : vector<1x16x64xbf16> to vector<16x64xbf16>
    %c0_2 = arith.constant 0 : index
    %c0_3 = arith.constant 0 : index
    %2 = vector.load %arg3[%c0_2, %c0_3] : memref<8x16xbf16, #tpu.memory_space<vmem>>, vector<8x16xbf16>
    %cst = arith.constant dense<0.000000e+00> : vector<8x64xf32>
    %3 = tpu.matmul %2, %1, %cst {dimension_numbers = #tpu.dot_dimension_numbers<[1], [0], [0], [1], [0, 0, 1, 1], [], []>} : vector<8x16xbf16>, vector<16x64xbf16>, vector<8x64xf32> -> vector<8x64xf32>
    %c0_4 = arith.constant 0 : index
    %c0_5 = arith.constant 0 : index
    %4 = vector.load %arg4[%c0_4, %c0_5] : memref<8x1xf32, #tpu.memory_space<vmem>>, vector<8x1xf32>
    %5 = vector.broadcast %4 : vector<8x1xf32> to vector<8x64xf32>
    %6 = arith.addf %3, %5 : vector<8x64xf32>
    %7 = arith.negf %6 : vector<8x64xf32>
    %8 = math.exp %7 : vector<8x64xf32>
    %cst_6 = arith.constant 1.000000e+00 : f32
    %9 = vector.broadcast %cst_6 : f32 to vector<8x64xf32>
    %10 = arith.addf %9, %8 : vector<8x64xf32>
    %11 = arith.divf %9, %10 : vector<8x64xf32>
    %12 = arith.mulf %6, %11 : vector<8x64xf32>
    %13 = arith.truncf %12 : vector<8x64xf32> to vector<8x64xbf16>
    %c0_7 = arith.constant 0 : index
    %c0_8 = arith.constant 0 : index
    %c0_9 = arith.constant 0 : index
    %14 = vector.load %arg5[%c0_7, %c0_8, %c0_9] : memref<1x8x64xbf16, #tpu.memory_space<vmem>>, vector<1x8x64xbf16>
    %15 = vector.shape_cast %14 : vector<1x8x64xbf16> to vector<8x64xbf16>
    %16 = vector.shape_cast %13 : vector<8x64xbf16> to vector<1x8x64xbf16>
    tpu.vector_store %arg5[%c0_7, %c0_8, %c0_9], %16 {strides = array<i32>} : memref<1x8x64xbf16, #tpu.memory_space<vmem>>, vector<1x8x64xbf16>,
    return
  }
  func.func @transform_0(%arg0: i32, %arg1: i32) -> (i32, i32, i32) {
    %c0_i32 = arith.constant 0 : i32
    %c0_i32_0 = arith.constant 0 : i32
    return %arg0, %c0_i32, %arg1 : i32, i32, i32
  }
  func.func @transform_1(%arg0: i32, %arg1: i32) -> (i32, i32) {
    %c0_i32 = arith.constant 0 : i32
    %c0_i32_0 = arith.constant 0 : i32
    %c0_i32_1 = arith.constant 0 : i32
    return %c0_i32, %c0_i32_0 : i32, i32
  }
  func.func @transform_2(%arg0: i32, %arg1: i32) -> (i32, i32) {
    %c0_i32 = arith.constant 0 : i32
    %c0_i32_0 = arith.constant 0 : i32
    %c0_i32_1 = arith.constant 0 : i32
    return %c0_i32, %c0_i32_0 : i32, i32
  }
  func.func @transform_3(%arg0: i32, %arg1: i32) -> (i32, i32, i32) {
    %c0_i32 = arith.constant 0 : i32
    %c0_i32_0 = arith.constant 0 : i32
    return %arg0, %c0_i32, %arg1 : i32, i32, i32
  }
}

</mosaic_0001>

<bundles_post_ra>
// kernel: focus_forward.1
= control target key start
LH: loop header
LB: loop body
LE: loop exit
PB: predicated region body
PF: predicated region fallthrough
CT: control target
= control target key end

     0   :  { %s426_s12 = smov 0   ;;  %s428_s13 = smov 0   ;;  %s469_s0 = inlined_call_operand.vmem [shape: bf16[2,16,64], index: 0, kind: input, shape index: {}]   ;;  %s470_s1 = inlined_call_operand.vmem [shape: bf16[8,16], index: 1, kind: input, shape index: {}]   ;;  %s471_s2 = inlined_call_operand.vmem [shape: f32[8,1], index: 2, kind: input, shape index: {}]   ;;  %s472_s3 = inlined_call_operand.vmem [shape: bf16[2,8,64], index: 3, kind: output, shape index: {}]  }
   0x1   :  { %s430_s14 = smov 0  }
   0x2 LB: > { %s25_s15 = sadd.s32 1, %s399_s13  ;;  %p337_p0 = scmp.ge.s32.totalorder %s403_s14, 1  ;;  %s403_s14 = sphi %s430_s14, %s13_s14   ;;  %s399_s13 = sphi %s428_s13, %s474_s13   ;;  %s395_s12 = sphi %s426_s12, %s473_s12  }
   0x3   : > { %p27_p1 = scmp.ge.s32.totalorder %s25_s15, 2  ;;  %p156_p2 = scmp.lt.s32.totalorder %s403_s14, 3 }
   0x5   : > { %s476_s15 = smov (%p27_p1, %s25_s15), 0  ;;  %p157_p3 = pnand %p337_p0, %p156_p2 }
   0x6   : > { %p185_p4 = scmp.lt.s32.totalorder (!%p157_p3), %s395_s12, 1 }
   0x7   : > { %160 = sbr.rel (%p157_p3) target bundleno = 180 (0xb4), region = 32 }
   0xc   : > { %v204_v0 = vld [vmem:[%s471_s2] sm:$0xff]  ;;  %v405_v1 = vmov 0   ;;  %s478_s12 = smov (!%p185_p4, %s395_s12), 1  ;;  %vm216_vm0 = vcmask 130048   ;;  %vm254_vm5 = vcmask 519168  }
   0xd   : > { %376 = vset.pattern.permute.xlu0 %v405_v1  ;;  %s349_s18 = sshll.u32 %s478_s12, 3  ;;  %v203_v3 = vld [vmem:[%s470_s1] sm:$0xf]  ;;  %s340_s24 = sshll.u32 %s478_s12, 2 }
   0xe   : > { %207 = vperm.xlu0 %376, %v204_v0   ;;  %s192_s21 = scalar_lea.vmem %s469_s0, %s349_s18  ;;  %s199_s27 = scalar_lea.vmem %s472_s3, %s340_s24 }
   0xf   : > { %v350_v2 = vld [vmem:[%s192_s21] sm:$0xff] }
  0x10   : > { %227 = vmatpush.bf16.msra.mxu0 %v350_v2 }
  0x13   : > { %345 = vmatmul.msk.bf16.vlgmr.msra.gmra.mxu0 %vm216_vm0, %v203_v3 }
  0x80   : > { %v208_v4 = vpop.permute.xlu0 %207 }
  0x90   : > { %v229_v5 = vpop.f32.mrf.mxu0 }
  0x91   : > { %v230_v6 = vadd.f32 %v229_v5, %v208_v4 }
  0x93   : > { %v346_v7 = vmul.f32 -1.442695, %v230_v6 }
  0x95   : > { %377 = vpow2.f32 %v346_v7 }
  0x98   : > { %v231_v8 = vpop.f32.mrf.mxu0 }
  0x9b   : > { %v378_v9 = vpop.eup %377 }
  0x9c   : > { %v236_v10 = vadd.f32 1.0, %v378_v9 }
  0x9e   : > { %379 = vrcp.f32 %v236_v10  ;;  %v248_v14 = vand.u32 2147483648, %v236_v10  ;;  %v246_v16 = vand.u32 2147483647, %v236_v10  ;;  %vm242_vm2 = vweird.f32 %v236_v10 }
  0xa0   : > { %v249_v18 = vor.u32 1.1754944e-38, %v248_v14  ;;  %vm247_vm4 = vcmp.eq.f32.partialorder %v246_v16, 8.507059e+37 }
  0xa4   : > { %v380_v11 = vpop.eup %379 }
  0xa5   : > { %v238_v12 = vmul.f32 %v380_v11, %v236_v10  ;;  %vm243_vm1 = vweird.f32 %v380_v11 }
  0xa6   : > { %vm244_vm3 = vmor %vm242_vm2, %vm243_vm1 }
  0xa7   : > { %v239_v13 = vsub.f32 1.0, %v238_v12 }
  0xa9   : > { %v240_v15 = vmul.f32 %v380_v11, %v239_v13 }
  0xab   : > { %v241_v17 = vadd.f32 %v380_v11, %v240_v15 }
  0xad   : > { %v245_v19 = vsel %vm244_vm3, %v380_v11, %v241_v17 }
  0xae   : > { %v250_v20 = vsel %vm247_vm4, %v249_v18, %v245_v19 }
  0xaf   : > { %v252_v21 = vmul.f32 %v250_v20, %v230_v6 }
  0xb1   : > { %v253_v22 = vpack.c.bf16 %v252_v21, %v252_v21 }
  0xb3   : > { %255 = vst.msk [vmem:[%s199_s27] sm:$0xf] %vm254_vm5, %v253_v22 }
  0xb4 PF: > { %s13_s14 = sadd.s32 1, %s403_s14   ;;  %s473_s12 = smov %s399_s13 }
  0xb5   : > { %p10_p5 = scmp.ge.s32.totalorder %s13_s14, 4   ;;  %s474_s13 = smov %s476_s15 }
  0xb7   :  { %12 = sbr.rel (!%p10_p5) target bundleno = 2 (0x2), region = 62 }

</bundles_post_ra>
